<compile_context>
chip_gen: v7x
topology: tpu7x:2x2x1
jax: 0.10.0
libtpu: 0.0.40
codegen_flags: <defaults>
</compile_context>

<pallas_src>
import functools

import jax
import jax.numpy as jnp
from jax.experimental import pallas as pl
from jax.experimental.pallas import tpu as pltpu


def _seg_head_fused_kernel(x_ref, w_ref, b_ref, out_ref, *, center_row):
    """One grid step: (C, tp) pixel tile -> (c_out_total, tp) fused-head output tile."""
    x = x_ref[...]                                    # (C, tp)        f32
    w = w_ref[...]                                    # (c_out, C)     f32
    b = b_ref[...]                                    # (c_out, 1)     f32

    out = jnp.dot(w, x, preferred_element_type=jnp.float32)  # (c_out, tp)
    out = out + b                                             # bias broadcast over lanes

    # Sigmoid only on the instance-center row (last output channel).
    row = jax.lax.broadcasted_iota(jnp.int32, out.shape, 0)
    out = jnp.where(row == center_row, jax.nn.sigmoid(out), out)

    out_ref[...] = out.astype(out_ref.dtype)


@functools.partial(jax.jit, static_argnames=("tp_target",))
def segmentation_head_forward(x_nchw, params, tp_target=2048):
    """Pallas forward pass for SegmentationHead.

    x_nchw: (N, C, H, W) float32
    params: dict with w_seg (C, n_classes), b_seg (n_classes,),
            w_off (C, 2), b_off (2,), w_ctr (C, 1), b_ctr (1,)
    """
    N, C, H, W = x_nchw.shape
    HW = H * W
    n_classes = params["w_seg"].shape[1]
    c_out = n_classes + 2 + 1  # seg | offset(2) | center(1)

    # Fused weight (c_out, C) and bias (c_out, 1); row order: seg..., off_x, off_y, center.
    w_fused = jnp.concatenate(
        [params["w_seg"].T, params["w_off"].T, params["w_ctr"].T], axis=0
    ).astype(jnp.float32)
    b_fused = jnp.concatenate(
        [params["b_seg"], params["b_off"], params["b_ctr"]], axis=0
    ).reshape(c_out, 1).astype(jnp.float32)

    # NCHW -> (N, C, HW): pure contiguous reshape, no transpose, no extra HBM pass.
    x = x_nchw.reshape(N, C, HW).astype(jnp.float32)

    # Pixel tile: full spatial extent if it fits, else a lane-dense 128-multiple tile.
    if HW <= tp_target:
        tp = HW
    else:
        assert tp_target % 128 == 0, "tp_target must be a multiple of 128"
        tp = tp_target
    num_tiles = pl.cdiv(HW, tp)
    grid = (N, num_tiles)

    cost = pl.CostEstimate(
        flops=2 * N * HW * C * c_out,
        transcendentals=N * HW,  # sigmoid on the center channel
        bytes_accessed=4 * (N * C * HW + N * c_out * HW + c_out * C + c_out),
    )

    out = pl.pallas_call(
        functools.partial(_seg_head_fused_kernel, center_row=c_out - 1),
        out_shape=jax.ShapeDtypeStruct((N, c_out, HW), jnp.float32),
        grid_spec=pltpu.PrefetchScalarGridSpec(
            num_scalar_prefetch=0,
            grid=grid,
            in_specs=[
                # x: (N, C, HW) -> kernel sees (C, tp); batch dim squeezed.
                pl.BlockSpec((None, C, tp), lambda n, j: (n, 0, j)),
                # fused weight / bias: whole arrays, resident across the grid.
                pl.BlockSpec((c_out, C), lambda n, j: (0, 0)),
                pl.BlockSpec((c_out, 1), lambda n, j: (0, 0)),
            ],
            out_specs=pl.BlockSpec((None, c_out, tp), lambda n, j: (n, 0, j)),
        ),
        compiler_params=pltpu.CompilerParams(
            dimension_semantics=("parallel", "parallel")),
        cost_estimate=cost,
    )(x, w_fused, b_fused)

    # Split the fused output slab and reshape back to NCHW (no transposes needed).
    seg = out[:, :n_classes, :].reshape(N, n_classes, H, W)
    off = out[:, n_classes:n_classes + 2, :].reshape(N, 2, H, W)
    ctr = out[:, n_classes + 2:, :].reshape(N, 1, H, W)

    # keys in the PyTorch module would be f"bev_*_{downsample_factor}"
    return {
        "bev_segmentation": seg,
        "bev_instance_offset": off,
        "bev_instance_center": ctr,
    }


def init_params(key, in_channels, n_classes):
    """Deterministic synthetic init matching nn.Conv2d(C_in, C_out, 1) shapes.

    PyTorch conv weight is (C_out, C_in, 1, 1); we store the transposed (C_in, C_out)
    matrix (what a converter would produce); the wrapper re-fuses/transposes once.
    """
    k = jax.random.split(key, 6)
    return {
        "w_seg": jax.random.normal(k[0], (in_channels, n_classes), jnp.float32) * 0.1,
        "b_seg": jax.random.normal(k[1], (n_classes,), jnp.float32) * 0.1,
        "w_off": jax.random.normal(k[2], (in_channels, 2), jnp.float32) * 0.1,
        "b_off": jax.random.normal(k[3], (2,), jnp.float32) * 0.1,
        "w_ctr": jax.random.normal(k[4], (in_channels, 1), jnp.float32) * 0.1,
        "b_ctr": jax.random.normal(k[5], (1,), jnp.float32) * 0.1,
    }


def _reference(x_nchw, params):
    """Pure-JAX reference (1x1 conv == einsum over channels)."""
    seg = jnp.einsum("nchw,ck->nkhw", x_nchw, params["w_seg"]) + params["b_seg"][None, :, None, None]
    off = jnp.einsum("nchw,ck->nkhw", x_nchw, params["w_off"]) + params["b_off"][None, :, None, None]
    ctr = jnp.einsum("nchw,ck->nkhw", x_nchw, params["w_ctr"]) + params["b_ctr"][None, :, None, None]
    ctr = jax.nn.sigmoid(ctr)
    return {"bev_segmentation": seg, "bev_instance_offset": off, "bev_instance_center": ctr}


if __name__ == "__main__":
    N, C, H, W = 2, 4, 16, 16
    n_classes = 8
    downsample_factor = 1  # only used for output dict key names in the PyTorch module

    key = jax.random.PRNGKey(0)
    kx, kp = jax.random.split(key)
    x = jax.random.normal(kx, (N, C, H, W), jnp.float32)
    params = init_params(kp, C, n_classes)

    out = segmentation_head_forward(x, params)
    jax.block_until_ready(out)

    ref = _reference(x, params)
    for name in out:
        assert out[name].shape == ref[name].shape, name
        assert jnp.allclose(out[name], ref[name], atol=1e-5, rtol=1e-5), name

    print("KERNEL_OK")
</pallas_src>

<mosaic_0001>
module attributes {stable_mosaic.version = 11 : i64} {
  func.func @_seg_head_fused_kernel(%arg0: i32, %arg1: i32, %arg2: memref<1x4x256xf32, #tpu.memory_space<vmem>>, %arg3: memref<11x4xf32, #tpu.memory_space<vmem>>, %arg4: memref<11x1xf32, #tpu.memory_space<vmem>>, %arg5: memref<1x11x256xf32, #tpu.memory_space<vmem>>) attributes {dimension_semantics = [#tpu.dimension_semantics<parallel>, #tpu.dimension_semantics<parallel>], iteration_bounds = array<i64: 2, 1>, scalar_prefetch = 0 : i64, scratch_operands = 0 : i64, tpu.core_type = #tpu.core_type<tc>, window_params = [{transform_indices = @transform_0, window_bounds = array<i64: 1, 4, 256>}, {pipeline_mode = #tpu.pipeline_mode<synchronous>, transform_indices = @transform_1, window_bounds = array<i64: 11, 4>}, {pipeline_mode = #tpu.pipeline_mode<synchronous>, transform_indices = @transform_2, window_bounds = array<i64: 11, 1>}, {transform_indices = @transform_3, window_bounds = array<i64: 1, 11, 256>}]} {
    %c0 = arith.constant 0 : index
    %c0_0 = arith.constant 0 : index
    %c0_1 = arith.constant 0 : index
    %0 = vector.load %arg2[%c0, %c0_0, %c0_1] : memref<1x4x256xf32, #tpu.memory_space<vmem>>, vector<1x4x256xf32>
    %1 = vector.shape_cast %0 : vector<1x4x256xf32> to vector<4x256xf32>
    %c0_2 = arith.constant 0 : index
    %c0_3 = arith.constant 0 : index
    %2 = vector.load %arg3[%c0_2, %c0_3] : memref<11x4xf32, #tpu.memory_space<vmem>>, vector<11x4xf32>
    %c0_4 = arith.constant 0 : index
    %c0_5 = arith.constant 0 : index
    %3 = vector.load %arg4[%c0_4, %c0_5] : memref<11x1xf32, #tpu.memory_space<vmem>>, vector<11x1xf32>
    %cst = arith.constant dense<0.000000e+00> : vector<11x256xf32>
    %4 = tpu.matmul %2, %1, %cst {dimension_numbers = #tpu.dot_dimension_numbers<[1], [0], [0], [1], [0, 0, 1, 1], [], []>} : vector<11x4xf32>, vector<4x256xf32>, vector<11x256xf32> -> vector<11x256xf32>
    %5 = vector.broadcast %3 : vector<11x1xf32> to vector<11x256xf32>
    %6 = arith.addf %4, %5 : vector<11x256xf32>
    %7 = tpu.iota {dimensions = array<i32: 0>} : vector<11x256xi32>
    %c10_i32 = arith.constant 10 : i32
    %8 = vector.broadcast %c10_i32 : i32 to vector<11x256xi32>
    %9 = arith.cmpi eq, %7, %8 : vector<11x256xi32>
    %10 = arith.negf %6 : vector<11x256xf32>
    %11 = math.exp %10 : vector<11x256xf32>
    %cst_6 = arith.constant 1.000000e+00 : f32
    %12 = vector.broadcast %cst_6 : f32 to vector<11x256xf32>
    %13 = arith.addf %12, %11 : vector<11x256xf32>
    %14 = arith.divf %12, %13 : vector<11x256xf32>
    %15 = arith.select %9, %14, %6 : vector<11x256xi1>, vector<11x256xf32>
    %c0_7 = arith.constant 0 : index
    %c0_8 = arith.constant 0 : index
    %c0_9 = arith.constant 0 : index
    %16 = vector.load %arg5[%c0_7, %c0_8, %c0_9] : memref<1x11x256xf32, #tpu.memory_space<vmem>>, vector<1x11x256xf32>
    %17 = vector.shape_cast %16 : vector<1x11x256xf32> to vector<11x256xf32>
    %18 = vector.shape_cast %15 : vector<11x256xf32> to vector<1x11x256xf32>
    tpu.vector_store %arg5[%c0_7, %c0_8, %c0_9], %18 {strides = array<i32>} : memref<1x11x256xf32, #tpu.memory_space<vmem>>, vector<1x11x256xf32>,
    return
  }
  func.func @transform_0(%arg0: i32, %arg1: i32) -> (i32, i32, i32) {
    %c0_i32 = arith.constant 0 : i32
    %c0_i32_0 = arith.constant 0 : i32
    return %arg0, %c0_i32, %arg1 : i32, i32, i32
  }
  func.func @transform_1(%arg0: i32, %arg1: i32) -> (i32, i32) {
    %c0_i32 = arith.constant 0 : i32
    %c0_i32_0 = arith.constant 0 : i32
    %c0_i32_1 = arith.constant 0 : i32
    return %c0_i32, %c0_i32_0 : i32, i32
  }
  func.func @transform_2(%arg0: i32, %arg1: i32) -> (i32, i32) {
    %c0_i32 = arith.constant 0 : i32
    %c0_i32_0 = arith.constant 0 : i32
    %c0_i32_1 = arith.constant 0 : i32
    return %c0_i32, %c0_i32_0 : i32, i32
  }
  func.func @transform_3(%arg0: i32, %arg1: i32) -> (i32, i32, i32) {
    %c0_i32 = arith.constant 0 : i32
    %c0_i32_0 = arith.constant 0 : i32
    return %arg0, %c0_i32, %arg1 : i32, i32, i32
  }
}

</mosaic_0001>

<bundles_post_ra>
// kernel: segmentation_head_forward.1
= control target key start
LH: loop header
LB: loop body
LE: loop exit
PB: predicated region body
PF: predicated region fallthrough
CT: control target
= control target key end

     0   :  { %s545_s12 = smov 0   ;;  %s547_s13 = smov 0   ;;  %s590_s0 = inlined_call_operand.vmem [shape: f32[2,4,256], index: 0, kind: input, shape index: {}]   ;;  %s591_s1 = inlined_call_operand.vmem [shape: f32[11,4], index: 1, kind: input, shape index: {}]   ;;  %s592_s2 = inlined_call_operand.vmem [shape: f32[11,1], index: 2, kind: input, shape index: {}]   ;;  %s593_s3 = inlined_call_operand.vmem [shape: f32[2,11,256], index: 3, kind: output, shape index: {}]  }
   0x1   :  { %s549_s14 = smov 0  }
   0x2 LB: > { %s25_s15 = sadd.s32 1, %s517_s13  ;;  %p444_p0 = scmp.ge.s32.totalorder %s521_s14, 1  ;;  %s521_s14 = sphi %s549_s14, %s13_s14   ;;  %s517_s13 = sphi %s547_s13, %s595_s13   ;;  %s513_s12 = sphi %s545_s12, %s594_s12  }
   0x3   : > { %p27_p1 = scmp.ge.s32.totalorder %s25_s15, 2  ;;  %p158_p2 = scmp.lt.s32.totalorder %s521_s14, 3 }
   0x5   : > { %s597_s15 = smov (%p27_p1, %s25_s15), 0  ;;  %p159_p3 = pnand %p444_p0, %p158_p2 }
   0x6   : > { %p191_p4 = scmp.lt.s32.totalorder (!%p159_p3), %s513_s12, 1  ;;  %v523_v0 = vmov (!%p159_p3), 0.0   ;;  %v214_v1 = vld [vmem:[%s592_s2 + $0x8] sm:$0x7] (!%p159_p3)  ;;  %v524_v2 = vmov (!%p159_p3), 0   ;;  %v213_v3 = vld [vmem:[%s592_s2] sm:$0xff] (!%p159_p3)  ;;  %v316_v20 = vlaneseq (!%p159_p3) }
   0x7   : > { %162 = sbr.rel (%p159_p3) target bundleno = 265 (0x109), region = 32  ;;  %303 = vmatprep.mubr.f32.mxu0 (!%p159_p3), %v523_v0  ;;  %309 = vmatprep.mubr.f32.mxu1 (!%p159_p3), %v523_v0  ;;  %vm234_vm0 = vcmask (!%p159_p3), 1043456   ;;  %v211_v6 = vld [vmem:[%s591_s1] sm:$0xff] (!%p159_p3)  ;;  %vm227_vm1 = vcmask (!%p159_p3), 31744   ;;  %v212_v7 = vld [vmem:[%s591_s1 + $0x8] sm:$0x7] (!%p159_p3) }
   0x8   : > { %489 = vset.pattern.permute.xlu0 (!%p159_p3), %v524_v2  ;;  %v317_v25 = vshrl.u32 (!%p159_p3), %v316_v20, 7 }
   0x9   : > { %222 = vperm.xlu0 (!%p159_p3), %489, %v214_v1  }
   0xa   : > { %v318_v26 = vadd.s32 (!%p159_p3), 8, %v317_v25 }
   0xc   : > { %vm320_vm2 = vcmp.eq.s32.totalorder (!%p159_p3), %v318_v26, 10 }
   0xd   : > { %217 = vperm.xlu0 (!%p159_p3), %489, %v213_v3  }
   0xe   : > { %s599_s12 = smov (!%p191_p4, %s513_s12), 1 }
   0xf   : > { %s459_s18 = sshll.u32 %s599_s12, 3  ;;  %s460_s28 = sshll.u32 %s599_s12, 5 }
  0x10   : > { %s198_s23 = scalar_lea.vmem %s590_s0, %s459_s18  ;;  %s208_s4 = scalar_lea.vmem %s593_s3, %s460_s28 }
  0x11   : > { %v210_v4 = vld [vmem:[%s198_s23] sm:$0xff] }
  0x12   : > { %v226_v5 = vcombine.high %v210_v4, %v210_v4 }
  0x14   : > { %449 = vmatprep.subr.msk.mxu0 %vm234_vm0, %v226_v5  ;;  %461 = vmatprep.subr.msk.mxu1 %vm234_vm0, %v226_v5 }
  0x15   : > { %450 = vmatpush1.msk.msra.mxu0 %vm234_vm0, %v210_v4  ;;  %462 = vmatpush1.msk.msra.mxu1 %vm234_vm0, %v210_v4 }
  0x16   : > { %451 = vmatmul.mubr.msk.f32.vlgmr.msra.gmra.mrb[0].mxu0 %vm227_vm1, %v211_v6  ;;  %452 = vmatmul.mubr.msk.f32.vlgmr.msra.gmra.mrb[0].mxu1 %vm227_vm1, %v212_v7 }
  0x88   : > { %v223_v8 = vpop.permute.xlu0 %222 }
  0x8c   : > { %v218_v9 = vpop.permute.xlu0 %217 }
  0xe9   : > { %v305_v10 = vpop.f32.mrb[0].mxu0  ;;  %v311_v11 = vpop.f32.mrb[0].mxu1 }
  0xea   : > { %v312_v12 = vadd.f32 %v311_v11, %v223_v8  ;;  %v306_v13 = vadd.f32 %v305_v10, %v218_v9  ;;  %v307_v14 = vpop.f32.mrb[1].mxu0  ;;  %v313_v15 = vpop.f32.mrb[1].mxu1 }
  0xeb   : > { %v308_v16 = vadd.f32 %v307_v14, %v218_v9  ;;  %v314_v17 = vadd.f32 %v313_v15, %v223_v8 }
  0xec   : > { %v455_v18 = vmul.f32 -1.442695, %v312_v12  ;;  %349 = vst [vmem:[%s208_s4] sm:$0xff] %v306_v13 }
  0xed   : > { %350 = vst [vmem:[%s208_s4 + $0x8] sm:$0xff] %v308_v16  ;;  %v456_v19 = vmul.f32 -1.442695, %v314_v17 }
  0xee   : > { %491 = vpow2.f32 %v455_v18 }
  0xef   : > { %493 = vpow2.f32 %v456_v19 }
  0xf8   : > { %v492_v21 = vpop.eup %491 }
  0xf9   : > { %v494_v22 = vpop.eup %493  ;;  %v335_v23 = vadd.f32 1.0, %v492_v21 }
  0xfa   : > { %v336_v24 = vadd.f32 1.0, %v494_v22 }
  0xfb   : > { %495 = vrcp.f32 %v335_v23 }
  0xfc   : > { %497 = vrcp.f32 %v336_v24 }
 0x105   : > { %v496_v27 = vpop.eup %495 }
 0x106   : > { %v498_v28 = vpop.eup %497  ;;  %v347_v29 = vsel %vm320_vm2, %v496_v27, %v312_v12 }
 0x107   : > { %351 = vst [vmem:[%s208_s4 + $0x10] sm:$0x7] %v347_v29  ;;  %v348_v30 = vsel %vm320_vm2, %v498_v28, %v314_v17 }
 0x108   : > { %352 = vst [vmem:[%s208_s4 + $0x18] sm:$0x7] %v348_v30 }
 0x109 PF: > { %s13_s14 = sadd.s32 1, %s521_s14   ;;  %s594_s12 = smov %s517_s13 }
 0x10a   : > { %p10_p5 = scmp.ge.s32.totalorder %s13_s14, 4   ;;  %s595_s13 = smov %s597_s15 }
 0x10c   :  { %12 = sbr.rel (!%p10_p5) target bundleno = 2 (0x2), region = 62 }

</bundles_post_ra>
